<compile_context>
chip_gen: v7x
topology: tpu7x:2x2x1
jax: 0.10.0
libtpu: 0.0.40
codegen_flags: <defaults>
</compile_context>

<pallas_src>
import functools
import math

import jax
import jax.numpy as jnp
from jax.experimental import pallas as pl
from jax.experimental.pallas import tpu as pltpu


def make_pe_table(d_model: int, max_len: int = 600) -> jnp.ndarray:
    """Sinusoidal PE table, shape (max_len, 1, d_model) like the torch buffer."""
    position = jnp.arange(max_len, dtype=jnp.float32)[:, None]
    div_term = jnp.exp(jnp.arange(0, d_model, 2, dtype=jnp.float32)
                       * (-math.log(10000.0) / d_model))
    pe = jnp.zeros((max_len, d_model), dtype=jnp.float32)
    pe = pe.at[:, 0::2].set(jnp.sin(position * div_term))
    pe = pe.at[:, 1::2].set(jnp.cos(position * div_term))
    return pe[:, None, :]


# ------------------------------ kernels ------------------------------------ #

def _pe_add_kernel(x_ref, pe_ref, o_ref):
    # x_ref: (B, ts, D); pe_ref: (1, ts, D) -> broadcast-add over batch.
    y = x_ref[...].astype(jnp.float32) + pe_ref[...]
    o_ref[...] = y.astype(o_ref.dtype)


def _pe_add_dropout_kernel(x_ref, pe_ref, bits_ref, o_ref, *, threshold, inv_keep):
    # Inverted dropout: keep with prob (1 - p), scale kept values by 1/(1 - p).
    # bits_ref holds uniform int32 bits; keep iff bits >= threshold.
    y = x_ref[...].astype(jnp.float32) + pe_ref[...]
    keep = bits_ref[...] >= jnp.int32(threshold)
    o_ref[...] = jnp.where(keep, y * jnp.float32(inv_keep), 0.0).astype(o_ref.dtype)


# ------------------------------- wrapper ------------------------------------ #

def _round_up(a: int, m: int) -> int:
    return (a + m - 1) // m * m


def positional_encoding(x: jnp.ndarray,
                        pe: jnp.ndarray,
                        *,
                        dropout_p: float = 0.1,
                        training: bool = False,
                        rng_key=None,
                        batch_first: bool = True,
                        seq_tile: int | None = None,
                        block_bytes: int = 4 * 1024 * 1024) -> jnp.ndarray:
    """x: (B, S, D) if batch_first else (S, B, D); pe: (max_len, 1, D) or (max_len, D)."""
    if not batch_first:                   # module convention: (S, B, D)
        x = jnp.swapaxes(x, 0, 1)         # kernel-native layout is (B, S, D)
    B, S, D = x.shape

    pe2d = pe[:, 0, :] if pe.ndim == 3 else pe     # (max_len, D)
    assert pe2d.shape[0] >= S and pe2d.shape[1] == D

    itemsize = jnp.dtype(x.dtype).itemsize
    if seq_tile is None:
        # Largest multiple-of-8 seq tile whose x block fits the per-block budget.
        max_rows = max(8, (block_bytes // max(1, B * D * itemsize)) // 8 * 8)
        seq_tile = min(_round_up(S, 8), max_rows)
    Sp = _round_up(S, seq_tile)

    pe_b = pe2d[:S][None]                 # (1, S, D)
    if Sp != S:
        x = jnp.pad(x, ((0, 0), (0, Sp - S), (0, 0)))
        pe_b = jnp.pad(pe_b, ((0, 0), (0, Sp - S), (0, 0)))

    grid = (Sp // seq_tile,)
    x_spec = pl.BlockSpec((B, seq_tile, D), lambda i: (0, i, 0))
    pe_spec = pl.BlockSpec((1, seq_tile, D), lambda i: (0, i, 0))
    out_spec = pl.BlockSpec((B, seq_tile, D), lambda i: (0, i, 0))
    out_shape = jax.ShapeDtypeStruct((B, Sp, D), x.dtype)
    cparams = pltpu.CompilerParams(
        dimension_semantics=("parallel",),          # independent tiles -> v7x 2-TC shard
        vmem_limit_bytes=48 * 1024 * 1024)          # safe under v7x's 64 MiB VMEM

    if (not training) or dropout_p == 0.0:
        out = pl.pallas_call(
            _pe_add_kernel,
            out_shape=out_shape,
            grid_spec=pltpu.PrefetchScalarGridSpec(
                num_scalar_prefetch=0, grid=grid,
                in_specs=[x_spec, pe_spec], out_specs=out_spec),
            compiler_params=cparams,
        )(x, pe_b)
    else:
        assert 0.0 < dropout_p < 1.0
        if rng_key is None:
            rng_key = jax.random.PRNGKey(0)
        bits_u32 = jax.random.bits(rng_key, (B, Sp, D), dtype=jnp.uint32)
        bits = jax.lax.bitcast_convert_type(bits_u32, jnp.int32)
        # int32 bits are uniform on [-2^31, 2^31); P(bits >= threshold) = 1 - p.
        threshold = int(round(dropout_p * (1 << 32))) - (1 << 31)
        kernel = functools.partial(_pe_add_dropout_kernel,
                                   threshold=threshold,
                                   inv_keep=1.0 / (1.0 - dropout_p))
        out = pl.pallas_call(
            kernel,
            out_shape=out_shape,
            grid_spec=pltpu.PrefetchScalarGridSpec(
                num_scalar_prefetch=0, grid=grid,
                in_specs=[x_spec, pe_spec, x_spec], out_specs=out_spec),
            compiler_params=cparams,
        )(x, pe_b, bits)

    if Sp != S:
        out = out[:, :S, :]
    if not batch_first:
        out = jnp.swapaxes(out, 0, 1)
    return out


# --------------------------------- main ------------------------------------- #

if __name__ == "__main__":
    S, B, D = 16, 2, 32
    MAX_LEN = 600

    key = jax.random.PRNGKey(0)
    kx, kd = jax.random.split(key)
    pe = make_pe_table(D, MAX_LEN)

    # Module-convention input (seq-first), exactly like the PyTorch forward.
    x_sbd = jax.random.normal(kx, (S, B, D), dtype=jnp.float32)
    ref = x_sbd + pe[:S]                              # pure-JAX reference (eval mode)

    out = jax.block_until_ready(
        positional_encoding(x_sbd, pe, dropout_p=0.1, training=False, batch_first=False))
    assert out.shape == (S, B, D)
    assert jnp.allclose(out, ref, atol=1e-6), "mismatch vs reference (seq-first path)"

    # Kernel-native batch-first layout (lane/sublane-dense fast path).
    x_bsd = jnp.transpose(x_sbd, (1, 0, 2))
    ref_bsd = jnp.transpose(ref, (1, 0, 2))
    out_bf = jax.block_until_ready(
        positional_encoding(x_bsd, pe, dropout_p=0.1, training=False, batch_first=True))
    assert out_bf.shape == (B, S, D)
    assert jnp.allclose(out_bf, ref_bsd, atol=1e-6), "mismatch vs reference (batch-first path)"

    # Training-mode dropout path (mask bits precomputed with jax.random).
    p = 0.1
    out_tr = jax.block_until_ready(
        positional_encoding(x_bsd, pe, dropout_p=p, training=True,
                            rng_key=kd, batch_first=True))
    assert out_tr.shape == (B, S, D)
    # Every element is either exactly 0 (dropped) or (x + pe) / (1 - p) (kept).
    kept = out_tr != 0
    assert jnp.allclose(jnp.where(kept, out_tr, 0.0),
                        jnp.where(kept, ref_bsd / (1.0 - p), 0.0),
                        atol=1e-5), "dropout values inconsistent with inverted scaling"

    print("KERNEL_OK")
</pallas_src>

<mosaic_0001>
module attributes {stable_mosaic.version = 11 : i64} {
  func.func @_pe_add_kernel(%arg0: i32, %arg1: memref<2x16x32xf32, #tpu.memory_space<vmem>>, %arg2: memref<1x16x32xf32, #tpu.memory_space<vmem>>, %arg3: memref<2x16x32xf32, #tpu.memory_space<vmem>>) attributes {dimension_semantics = [#tpu.dimension_semantics<parallel>], iteration_bounds = array<i64: 1>, scalar_prefetch = 0 : i64, scratch_operands = 0 : i64, tpu.core_type = #tpu.core_type<tc>, window_params = [{transform_indices = @transform_0, window_bounds = array<i64: 2, 16, 32>}, {transform_indices = @transform_1, window_bounds = array<i64: 1, 16, 32>}, {transform_indices = @transform_2, window_bounds = array<i64: 2, 16, 32>}]} {
    %c0 = arith.constant 0 : index
    %c0_0 = arith.constant 0 : index
    %c0_1 = arith.constant 0 : index
    %0 = vector.load %arg1[%c0, %c0_0, %c0_1] : memref<2x16x32xf32, #tpu.memory_space<vmem>>, vector<2x16x32xf32>
    %c0_2 = arith.constant 0 : index
    %c0_3 = arith.constant 0 : index
    %c0_4 = arith.constant 0 : index
    %1 = vector.load %arg2[%c0_2, %c0_3, %c0_4] : memref<1x16x32xf32, #tpu.memory_space<vmem>>, vector<1x16x32xf32>
    %2 = vector.broadcast %1 : vector<1x16x32xf32> to vector<2x16x32xf32>
    %3 = arith.addf %0, %2 : vector<2x16x32xf32>
    %c0_5 = arith.constant 0 : index
    %c0_6 = arith.constant 0 : index
    %c0_7 = arith.constant 0 : index
    %4 = vector.load %arg3[%c0_5, %c0_6, %c0_7] : memref<2x16x32xf32, #tpu.memory_space<vmem>>, vector<2x16x32xf32>
    tpu.vector_store %arg3[%c0_5, %c0_6, %c0_7], %3 {strides = array<i32>} : memref<2x16x32xf32, #tpu.memory_space<vmem>>, vector<2x16x32xf32>,
    return
  }
  func.func @transform_0(%arg0: i32) -> (i32, i32, i32) {
    %c0_i32 = arith.constant 0 : i32
    %c0_i32_0 = arith.constant 0 : i32
    %c0_i32_1 = arith.constant 0 : i32
    return %c0_i32, %arg0, %c0_i32_0 : i32, i32, i32
  }
  func.func @transform_1(%arg0: i32) -> (i32, i32, i32) {
    %c0_i32 = arith.constant 0 : i32
    %c0_i32_0 = arith.constant 0 : i32
    %c0_i32_1 = arith.constant 0 : i32
    return %c0_i32, %arg0, %c0_i32_0 : i32, i32, i32
  }
  func.func @transform_2(%arg0: i32) -> (i32, i32, i32) {
    %c0_i32 = arith.constant 0 : i32
    %c0_i32_0 = arith.constant 0 : i32
    %c0_i32_1 = arith.constant 0 : i32
    return %c0_i32, %arg0, %c0_i32_0 : i32, i32, i32
  }
}

</mosaic_0001>

<bundles_post_ra>
// kernel: tpu_custom_call.1
= control target key start
LH: loop header
LB: loop body
LE: loop exit
PB: predicated region body
PF: predicated region fallthrough
CT: control target
= control target key end

     0   :  { %7 = vsyncpa [#allocation3], 0  ;;  %s215_s0 = inlined_call_operand.hbm [shape: f32[2,16,32], index: 0, kind: input, shape index: {}]   ;;  %s216_s1 = inlined_call_operand.hbm [shape: f32[1,16,32], index: 1, kind: input, shape index: {}]   ;;  %s217_s2 = inlined_call_operand.hbm [shape: f32[2,16,32], index: 2, kind: output, shape index: {}]  }
   0x1   :  { %8 = vsyncpa [#allocation6], 0 }
   0x2   :  { %9 = vsyncpa [#allocation4], 0  ;;  %s150_s9 = smov [#allocation2]   ;;  %s78_s13 = scalar_lea.hbm %s215_s0, 512 }
   0x3   :  { %s15_s10 = sshll.u32 %s150_s9, 4  ;;  %p79_p0 = scmp.ne.s32.totalorder %s215_s0, %s78_s13  ;;  %s16_s10 = int_to_ptr.vmem [resolvable:$true] %s15_s10 }
   0x4   :  { %p82_p1 = scmp.lt.u32.totalorder %s78_s13, %s215_s0 }
   0x6   :  { %p84_p2 = pnand %p82_p1, %p79_p0 }
   0x8   :  { %87 = shalt.err (!%p84_p2)
}
   0x9   :  { %s88_s18 = scalar_lea.vmem %s16_s10, 512  ;;  %p93_p4 = scmp.lt.s32.totalorder %s16_s10, %s16_s10 }
   0xa   :  { %p89_p3 = scmp.ne.s32.totalorder %s16_s10, %s88_s18  ;;  %p94_p5 = scmp.lt.s32.totalorder %s88_s18, %s88_s18 }
   0xc   :  { %p95_p6 = por %p94_p5, %p93_p4 }
   0xe   :  { %p96_p7 = pnand %p95_p6, %p89_p3 }
  0x10   :  { %99 = shalt.err (!%p96_p7)
}
  0x11   :  { %s151_s19 = smov 128   ;;  %s152_s20 = smov 8  }
  0x12   :  { %21 = dma.hbm_to_vmem [thread:$0]  %s215_s0, 512, %s16_s10, [#allocation3], %s151_s19, %s151_s19, %s152_s20  }
  0x13   :  { %s153_s23 = smov [#allocation5]   ;;  %s100_s27 = scalar_lea.hbm %s216_s1, 256 }
  0x14   :  { %s27_s24 = sshll.u32 %s153_s23, 4  ;;  %p101_p8 = scmp.ne.s32.totalorder %s216_s1, %s100_s27  ;;  %s28_s24 = int_to_ptr.vmem [resolvable:$true] %s27_s24 }
  0x15   :  { %p104_p9 = scmp.lt.u32.totalorder %s100_s27, %s216_s1 }
  0x17   :  { %p106_p10 = pnand %p104_p9, %p101_p8 }
  0x19   :  { %109 = shalt.err (!%p106_p10)
}
  0x1a   :  { %s110_s4 = scalar_lea.vmem %s28_s24, 256  ;;  %p115_p12 = scmp.lt.s32.totalorder %s28_s24, %s28_s24 }
  0x1b   :  { %p111_p11 = scmp.ne.s32.totalorder %s28_s24, %s110_s4  ;;  %p116_p13 = scmp.lt.s32.totalorder %s110_s4, %s110_s4 }
  0x1d   :  { %p117_p0 = por %p116_p13, %p115_p12 }
  0x1f   :  { %p118_p1 = pnand %p117_p0, %p111_p11 }
  0x21   :  { %121 = shalt.err (!%p118_p1)
}
  0x22   :  { %33 = dma.hbm_to_vmem [thread:$0]  %s216_s1, 256, %s28_s24, [#allocation6], %s151_s19, %s151_s19, %s152_s20  }
  0x23   :  { %144 = dma.done.wait [#allocation3], 512  }
  0x24   :  { %145 = vsyncadd [#allocation3], 4294966784 }
  0x25   :  { %146 = dma.done.wait [#allocation6], 256  }
  0x26   :  { %147 = vsyncadd [#allocation6], 4294967040  ;;  %s154_s6 = smov [#allocation7]   ;;  %v40_v0 = vld [vmem:[#allocation2] sm:$0xff]  ;;  %vm50_vm0 = vcmask 261120   ;;  %v41_v2 = vld [vmem:[#allocation2 + $0x8] sm:$0xff] }
  0x27   :  { %s60_s7 = sshll.u32 %s154_s6, 4  ;;  %v44_v1 = vld [vmem:[#allocation5] sm:$0xff]  ;;  %v45_v4 = vld [vmem:[#allocation5 + $0x8] sm:$0xff]  ;;  %v42_v5 = vld [vmem:[#allocation2 + $0x10] sm:$0xff]  ;;  %s61_s7 = int_to_ptr.vmem [resolvable:$true] %s60_s7 }
  0x28   :  { %v46_v3 = vadd.f32 %v44_v1, %v40_v0  ;;  %v43_v6 = vld [vmem:[#allocation2 + $0x18] sm:$0xff]  ;;  %v47_v7 = vadd.f32 %v45_v4, %v41_v2  ;;  %v48_v8 = vadd.f32 %v44_v1, %v42_v5  ;;  %s122_s1 = scalar_lea.vmem %s61_s7, 512  ;;  %p127_p3 = scmp.lt.s32.totalorder %s61_s7, %s61_s7 }
  0x29   :  { %v49_v9 = vadd.f32 %v45_v4, %v43_v6  ;;  %p123_p2 = scmp.ne.s32.totalorder %s61_s7, %s122_s1  ;;  %p128_p4 = scmp.lt.s32.totalorder %s122_s1, %s122_s1 }
  0x2a   :  { %51 = vst.msk [vmem:[#allocation7] sm:$0xff] %vm50_vm0, %v46_v3  ;;  %52 = vst.msk [vmem:[#allocation7 + $0x8] sm:$0xff] %vm50_vm0, %v47_v7 }
  0x2b   :  { %53 = vst.msk [vmem:[#allocation7 + $0x10] sm:$0xff] %vm50_vm0, %v48_v8  ;;  %54 = vst.msk [vmem:[#allocation7 + $0x18] sm:$0xff] %vm50_vm0, %v49_v9  ;;  %p129_p5 = por %p128_p4, %p127_p3 }
  0x2d   :  { %p130_p6 = pnand %p129_p5, %p123_p2 }
  0x2f   :  { %133 = shalt.err (!%p130_p6)
}
  0x30   :  { %s134_s10 = scalar_lea.hbm %s217_s2, 512 }
  0x31   :  { %p135_p7 = scmp.ne.s32.totalorder %s217_s2, %s134_s10  ;;  %p138_p8 = scmp.lt.u32.totalorder %s134_s10, %s217_s2 }
  0x33   :  { %p140_p9 = pnand %p138_p8, %p135_p7 }
  0x35   :  { %143 = shalt.err (!%p140_p9)
}
  0x36   :  { %66 = dma.vmem_to_hbm [thread:$0]  %s61_s7, 512, %s217_s2, [#allocation4], %s151_s19, %s151_s19, %s152_s20  }
  0x37   :  { %148 = dma.done.wait [#allocation4], 512  }
  0x38   :  { %149 = vsyncadd [#allocation4], 4294966784 }
  0x39   :  { %70 = vsyncpa [#allocation3], 1 }
  0x3a   :  { %71 = vsyncpa [#allocation6], 1 }
  0x3b   :  { %72 = vsyncpa [#allocation4], 1 }

</bundles_post_ra>
